<compile_context>
chip_gen: v7x
topology: tpu7x:2x2x1
jax: 0.10.0
libtpu: 0.0.40
codegen_flags: <defaults>
</compile_context>

<pallas_src>
import functools

import jax
import jax.numpy as jnp
from jax.experimental import pallas as pl
from jax.experimental.pallas import tpu as pltpu

LN_EPS = 1e-5  # PyTorch nn.LayerNorm default eps


def _round_up(x, m):
    return ((x + m - 1) // m) * m


def _cdiv(a, b):
    return (a + b - 1) // b


def _vmem_caps():
    """(scoped vmem limit, tiling budget) in bytes — generation aware."""
    try:
        cap = int(getattr(pltpu.get_tpu_info(), "vmem_capacity_bytes", 0)) or 64 * 1024 * 1024
    except Exception:
        cap = 64 * 1024 * 1024  # assume the most restrictive (v7x per-TensorCore)
    limit = (cap * 3) // 4                       # 48 MiB on v7x, 96 MiB on v5e/v6e
    budget = max(limit - 4 * 1024 * 1024, 16 * 1024 * 1024)
    return limit, budget


def _choose_k_tile(k128, e_pad, w_bytes, budget):
    """Keep the (double-buffered) weight slice under ~1/3 of the VMEM budget.

    For ordinary ViT configs this returns the full K (single K step); for very
    large E*K (f32, E>=1280) it falls back to K-tiling instead of failing.
    """
    if 2 * k128 * e_pad * w_bytes <= budget // 3:
        return k128
    tk = 1024
    while tk > 128 and 2 * tk * e_pad * w_bytes > budget // 3:
        tk //= 2
    return tk


def _choose_row_tile(m, tk, e_pad, in_bytes, out_bytes, w_bytes, budget, tm_cap=1024):
    """Row tile that fits the VMEM budget and gives a well-shaped grid."""
    # Streamed/pinned operands: double-buffered weight slice + the f32 vectors.
    fixed = 2 * tk * e_pad * w_bytes + 2 * 3 * e_pad * 4
    # Per-row cost: double-buffered input tile + double-buffered output tile
    # + f32 accumulator scratch (4B) + ~3 f32 LN-epilogue temporaries (12B).
    per_row = 2 * tk * in_bytes + 2 * e_pad * out_bytes + 16 * e_pad
    tm_vmem = max(8, (budget - fixed) // max(per_row, 1))
    # Aim for >= ~8 grid steps along M so DMA overlaps compute and M_pad waste
    # stays small (a 1-2 step grid exposes the whole input DMA).
    tm_target = max(8, _round_up(_cdiv(m, 8), 8))
    tm = min(tm_vmem, tm_cap, tm_target, _round_up(m, 8))
    tm = max(8, (tm // 8) * 8)
    # Prefer an even number of M steps (clean split across v7x's 2 TensorCores).
    n = _cdiv(m, tm)
    if n > 1 and n % 2 == 1:
        tm_alt = max(8, _round_up(_cdiv(m, n + 1), 8))
        if _cdiv(m, tm_alt) % 2 == 0:
            tm = tm_alt
    return tm


def _patch_embed_kernel(x_ref, w_ref, b_ref, g_ref, beta_ref, o_ref, acc_ref, *, e_real):
    # x_ref:    [TM, TK]       flattened (zero-padded) patches, K slice
    # w_ref:    [TK, E_pad]    pre-transposed projection weight slice
    # b_ref:    [1, E_pad] f32 projection bias   (zero-padded past e_real)
    # g_ref:    [1, E_pad] f32 LayerNorm gamma   (zero-padded past e_real)
    # beta_ref: [1, E_pad] f32 LayerNorm beta    (zero-padded past e_real)
    # o_ref:    [TM, E_pad]
    # acc_ref:  [TM, E_pad] f32 accumulator scratch
    k = pl.program_id(1)

    @pl.when(k == 0)
    def _():
        acc_ref[...] = jnp.zeros_like(acc_ref)

    acc_ref[...] += jnp.dot(x_ref[...], w_ref[...], preferred_element_type=jnp.float32)

    @pl.when(k == pl.num_programs(1) - 1)
    def _():
        acc = acc_ref[...] + b_ref[...]
        # Padded columns of `acc` are exactly zero (zero weight cols + zero bias),
        # so full-row sums equal sums over the real E; variance via E[x^2]-mean^2
        # avoids any per-step masking pass.
        inv_e = jnp.float32(1.0 / e_real)
        mean = jnp.sum(acc, axis=-1, keepdims=True) * inv_e
        ex2 = jnp.sum(acc * acc, axis=-1, keepdims=True) * inv_e
        var = jnp.maximum(ex2 - mean * mean, 0.0)
        inv = jax.lax.rsqrt(var + LN_EPS)  # EUP slot
        out = (acc - mean) * inv * g_ref[...] + beta_ref[...]
        o_ref[...] = out.astype(o_ref.dtype)


def patch_embed_forward(x, conv_w, conv_b, ln_g, ln_b, patch_size,
                        matmul_dtype=jnp.bfloat16, out_dtype=None):
    """x: [B, C, H, W] (NCHW, matching PyTorch). Returns (out[B, N, E], (Hp, Wp)).

    matmul_dtype: dtype of the MXU operands (default bf16; accumulation is
    always f32, so vs an f32 reference use a looser tolerance).
    out_dtype: output dtype (defaults to x.dtype; pass bf16 to halve writeback).
    """
    B, C, H, W = x.shape
    ph, pw = patch_size
    assert H % ph == 0 and W % pw == 0
    Hp, Wp = H // ph, W // pw
    N = Hp * Wp
    E = conv_w.shape[0]
    K = C * ph * pw
    M = B * N

    out_dtype = jnp.dtype(out_dtype) if out_dtype is not None else jnp.dtype(x.dtype)
    mm_dtype = jnp.dtype(matmul_dtype) if matmul_dtype is not None else jnp.dtype(x.dtype)

    vmem_limit, budget = _vmem_caps()

    # --- lane / MXU alignment and tile selection ---
    K128 = _round_up(K, 128)
    E_pad = _round_up(E, 128)
    TK = _choose_k_tile(K128, E_pad, mm_dtype.itemsize, budget)
    K_pad = _round_up(K, TK)
    n_k = K_pad // TK

    TM = _choose_row_tile(M, TK, E_pad, mm_dtype.itemsize, out_dtype.itemsize,
                          mm_dtype.itemsize, budget)
    M_pad = _round_up(M, TM)
    n_m = M_pad // TM

    # --- glue: non-overlapping patches flattened in (C, ph, pw) order ---
    # allow_input_fusion on this operand lets XLA fuse the reshape/transpose into
    # the pallas_call input DMA instead of materializing `patches` in HBM.
    # TODO(synk): longer term, grid directly over (B, Hp) on the raw NCHW tensor
    # with pl.Element/Squeezed dims to remove the wrapper glue entirely.
    patches = x.reshape(B, C, Hp, ph, Wp, pw).transpose(0, 2, 4, 1, 3, 5).reshape(M, K)
    patches = patches.astype(mm_dtype)
    if (M_pad, K_pad) != (M, K):
        patches = jnp.pad(patches, ((0, M_pad - M), (0, K_pad - K)))

    # Conv weight (E, C, ph, pw) -> (K, E): transposed ONCE here (a few MiB, one
    # HBM pass) so the kernel never needs an in-loop XLU transpose of the weight.
    w = conv_w.reshape(E, K).T.astype(mm_dtype)
    if (K_pad, E_pad) != (K, E):
        w = jnp.pad(w, ((0, K_pad - K), (0, E_pad - E)))

    def _pad_vec(v):
        v = v.astype(jnp.float32).reshape(1, E)
        return jnp.pad(v, ((0, 0), (0, E_pad - E))) if E_pad != E else v

    b = _pad_vec(conv_b)
    g = _pad_vec(ln_g)
    beta = _pad_vec(ln_b)

    kernel = functools.partial(_patch_embed_kernel, e_real=E)

    cost = pl.CostEstimate(
        flops=2 * M_pad * K_pad * E_pad,
        transcendentals=M_pad,  # one rsqrt per row
        bytes_accessed=int(M_pad * K_pad * mm_dtype.itemsize
                           + n_m * K_pad * E_pad * mm_dtype.itemsize
                           + M_pad * E_pad * out_dtype.itemsize),
    )

    # TODO(synk): mark the pinned weight/bias/gamma/beta specs with
    # pipeline_mode=pl.Buffered(1) to drop their second VMEM buffer once
    # buffer_count=1 support is confirmed on the target JAX version.
    out_flat = pl.pallas_call(
        kernel,
        out_shape=jax.ShapeDtypeStruct((M_pad, E_pad), out_dtype),
        grid=(n_m, n_k),
        in_specs=[
            pl.BlockSpec((TM, TK), lambda i, k: (i, k)),      # patch row/K tile
            pl.BlockSpec((TK, E_pad), lambda i, k: (k, 0)),   # weight K slice
            pl.BlockSpec((1, E_pad), lambda i, k: (0, 0)),    # bias (pinned)
            pl.BlockSpec((1, E_pad), lambda i, k: (0, 0)),    # LN gamma (pinned)
            pl.BlockSpec((1, E_pad), lambda i, k: (0, 0)),    # LN beta (pinned)
        ],
        out_specs=pl.BlockSpec((TM, E_pad), lambda i, k: (i, 0)),
        scratch_shapes=[pltpu.VMEM((TM, E_pad), jnp.float32)],
        compiler_params=pltpu.CompilerParams(
            dimension_semantics=("parallel", "arbitrary"),
            vmem_limit_bytes=int(vmem_limit),
            allow_input_fusion=[True, False, False, False, False],
        ),
        cost_estimate=cost,
    )(patches, w, b, g, beta)

    out = out_flat[:M, :E].reshape(B, N, E)
    return out, (Hp, Wp)


def reference_forward(x, conv_w, conv_b, ln_g, ln_b, patch_size):
    """Pure-JAX reference mirroring the PyTorch forward."""
    ph, pw = patch_size
    y = jax.lax.conv_general_dilated(
        x, conv_w, window_strides=(ph, pw), padding="VALID",
        dimension_numbers=("NCHW", "OIHW", "NCHW"))
    y = y + conv_b[None, :, None, None]
    B, E, Hp, Wp = y.shape
    y = y.reshape(B, E, Hp * Wp).transpose(0, 2, 1)          # [B, N, E]
    mean = jnp.mean(y, axis=-1, keepdims=True)
    var = jnp.mean((y - mean) ** 2, axis=-1, keepdims=True)
    y = (y - mean) * jax.lax.rsqrt(var + LN_EPS) * ln_g + ln_b
    return y, (Hp, Wp)


if __name__ == "__main__":
    # Small shapes consistent with the module:
    # img_size=16, patch_size=4, in_chans=4, embed_dim=32, batch=2
    B, C, H, W = 2, 4, 16, 16
    ph = pw = 4
    E = 32

    key = jax.random.PRNGKey(0)
    k1, k2, k3, k4, k5 = jax.random.split(key, 5)
    x = jax.random.normal(k1, (B, C, H, W), dtype=jnp.float32)
    conv_w = jax.random.normal(k2, (E, C, ph, pw), dtype=jnp.float32) * 0.05
    conv_b = jax.random.normal(k3, (E,), dtype=jnp.float32) * 0.05
    ln_g = 1.0 + 0.1 * jax.random.normal(k4, (E,), dtype=jnp.float32)
    ln_b = 0.1 * jax.random.normal(k5, (E,), dtype=jnp.float32)

    ref, (Hp_ref, Wp_ref) = reference_forward(x, conv_w, conv_b, ln_g, ln_b, (ph, pw))

    # Exact-precision path (f32 MXU operands): tight tolerance vs the reference.
    out_f32, (Hp, Wp) = patch_embed_forward(
        x, conv_w, conv_b, ln_g, ln_b, (ph, pw), matmul_dtype=jnp.float32)
    out_f32 = jax.block_until_ready(out_f32)
    assert out_f32.shape == (B, (H // ph) * (W // pw), E)
    assert (Hp, Wp) == (Hp_ref, Wp_ref)
    assert jnp.allclose(out_f32, ref, atol=1e-4, rtol=1e-4), "f32 path mismatch vs reference"

    # Default path (bf16 MXU operands, f32 accumulation): looser tolerance by design.
    out_bf16, _ = patch_embed_forward(x, conv_w, conv_b, ln_g, ln_b, (ph, pw))
    out_bf16 = jax.block_until_ready(out_bf16)
    assert out_bf16.shape == (B, (H // ph) * (W // pw), E)
    assert jnp.allclose(out_bf16, ref, atol=1e-1, rtol=1e-1), "bf16 path mismatch vs reference"

    print("KERNEL_OK")
</pallas_src>

<mosaic_0001>
module attributes {stable_mosaic.version = 11 : i64} {
  func.func @_patch_embed_kernel(%arg0: i32, %arg1: i32, %arg2: memref<8x128xf32, #tpu.memory_space<vmem>>, %arg3: memref<128x128xf32, #tpu.memory_space<vmem>>, %arg4: memref<1x128xf32, #tpu.memory_space<vmem>>, %arg5: memref<1x128xf32, #tpu.memory_space<vmem>>, %arg6: memref<1x128xf32, #tpu.memory_space<vmem>>, %arg7: memref<8x128xf32, #tpu.memory_space<vmem>>, %arg8: memref<8x128xf32, #tpu.memory_space<vmem>>) attributes {dimension_semantics = [#tpu.dimension_semantics<parallel>, #tpu.dimension_semantics<arbitrary>], iteration_bounds = array<i64: 4, 1>, scalar_prefetch = 0 : i64, scratch_operands = 1 : i64, tpu.core_type = #tpu.core_type<tc>, window_params = [{transform_indices = @transform_0, window_bounds = array<i64: 8, 128>}, {transform_indices = @transform_1, window_bounds = array<i64: 128, 128>}, {pipeline_mode = #tpu.pipeline_mode<synchronous>, transform_indices = @transform_2, window_bounds = array<i64: 1, 128>}, {pipeline_mode = #tpu.pipeline_mode<synchronous>, transform_indices = @transform_3, window_bounds = array<i64: 1, 128>}, {pipeline_mode = #tpu.pipeline_mode<synchronous>, transform_indices = @transform_4, window_bounds = array<i64: 1, 128>}, {transform_indices = @transform_5, window_bounds = array<i64: 8, 128>}]} {
    %c0_i32 = arith.constant 0 : i32
    %0 = arith.cmpi eq, %arg1, %c0_i32 : i32
    %1 = arith.extui %0 : i1 to i32
    %c0_i32_0 = arith.constant 0 : i32
    %2 = arith.cmpi ne, %1, %c0_i32_0 : i32
    scf.if %2 {
      %cst_10 = arith.constant 0.000000e+00 : f32
      %12 = vector.broadcast %cst_10 : f32 to vector<8x128xf32>
      %c0_11 = arith.constant 0 : index
      %c0_12 = arith.constant 0 : index
      %13 = vector.load %arg8[%c0_11, %c0_12] : memref<8x128xf32, #tpu.memory_space<vmem>>, vector<8x128xf32>
      tpu.vector_store %arg8[%c0_11, %c0_12], %12 {strides = array<i32>} : memref<8x128xf32, #tpu.memory_space<vmem>>, vector<8x128xf32>,
    } else {
    }
    %c0 = arith.constant 0 : index
    %c0_1 = arith.constant 0 : index
    %3 = vector.load %arg8[%c0, %c0_1] : memref<8x128xf32, #tpu.memory_space<vmem>>, vector<8x128xf32>
    %c0_2 = arith.constant 0 : index
    %c0_3 = arith.constant 0 : index
    %4 = vector.load %arg2[%c0_2, %c0_3] : memref<8x128xf32, #tpu.memory_space<vmem>>, vector<8x128xf32>
    %c0_4 = arith.constant 0 : index
    %c0_5 = arith.constant 0 : index
    %5 = vector.load %arg3[%c0_4, %c0_5] : memref<128x128xf32, #tpu.memory_space<vmem>>, vector<128x128xf32>
    %cst = arith.constant dense<0.000000e+00> : vector<8x128xf32>
    %6 = tpu.matmul %4, %5, %cst {dimension_numbers = #tpu.dot_dimension_numbers<[1], [0], [0], [1], [0, 0, 1, 1], [], []>} : vector<8x128xf32>, vector<128x128xf32>, vector<8x128xf32> -> vector<8x128xf32>
    %7 = arith.addf %3, %6 : vector<8x128xf32>
    %c0_6 = arith.constant 0 : index
    %c0_7 = arith.constant 0 : index
    %8 = vector.load %arg8[%c0_6, %c0_7] : memref<8x128xf32, #tpu.memory_space<vmem>>, vector<8x128xf32>
    tpu.vector_store %arg8[%c0_6, %c0_7], %7 {strides = array<i32>} : memref<8x128xf32, #tpu.memory_space<vmem>>, vector<8x128xf32>,
    %c0_i32_8 = arith.constant 0 : i32
    %9 = arith.cmpi eq, %arg1, %c0_i32_8 : i32
    %10 = arith.extui %9 : i1 to i32
    %c0_i32_9 = arith.constant 0 : i32
    %11 = arith.cmpi ne, %10, %c0_i32_9 : i32
    scf.if %11 {
      %c0_10 = arith.constant 0 : index
      %c0_11 = arith.constant 0 : index
      %12 = vector.load %arg8[%c0_10, %c0_11] : memref<8x128xf32, #tpu.memory_space<vmem>>, vector<8x128xf32>
      %c0_12 = arith.constant 0 : index
      %c0_13 = arith.constant 0 : index
      %13 = vector.load %arg4[%c0_12, %c0_13] : memref<1x128xf32, #tpu.memory_space<vmem>>, vector<1x128xf32>
      %14 = vector.broadcast %13 : vector<1x128xf32> to vector<8x128xf32>
      %15 = arith.addf %12, %14 : vector<8x128xf32>
      %cst_14 = arith.constant dense<0.000000e+00> : vector<8xf32>
      %16 = vector.multi_reduction <add>, %15, %cst_14 [1] : vector<8x128xf32> to vector<8xf32>
      %17 = vector.shape_cast %16 : vector<8xf32> to vector<8x1xf32>
      %cst_15 = arith.constant 3.125000e-02 : f32
      %18 = vector.broadcast %cst_15 : f32 to vector<8x1xf32>
      %19 = arith.mulf %17, %18 : vector<8x1xf32>
      %20 = arith.mulf %15, %15 : vector<8x128xf32>
      %cst_16 = arith.constant dense<0.000000e+00> : vector<8xf32>
      %21 = vector.multi_reduction <add>, %20, %cst_16 [1] : vector<8x128xf32> to vector<8xf32>
      %22 = vector.shape_cast %21 : vector<8xf32> to vector<8x1xf32>
      %cst_17 = arith.constant 3.125000e-02 : f32
      %23 = vector.broadcast %cst_17 : f32 to vector<8x1xf32>
      %24 = arith.mulf %22, %23 : vector<8x1xf32>
      %25 = arith.mulf %19, %19 : vector<8x1xf32>
      %26 = arith.subf %24, %25 : vector<8x1xf32>
      %cst_18 = arith.constant 0.000000e+00 : f32
      %27 = vector.broadcast %cst_18 : f32 to vector<8x1xf32>
      %28 = arith.maximumf %26, %27 : vector<8x1xf32>
      %cst_19 = arith.constant 9.99999974E-6 : f32
      %29 = vector.broadcast %cst_19 : f32 to vector<8x1xf32>
      %30 = arith.addf %28, %29 : vector<8x1xf32>
      %31 = math.rsqrt %30 : vector<8x1xf32>
      %32 = vector.broadcast %19 : vector<8x1xf32> to vector<8x128xf32>
      %33 = arith.subf %15, %32 : vector<8x128xf32>
      %34 = vector.broadcast %31 : vector<8x1xf32> to vector<8x128xf32>
      %35 = arith.mulf %33, %34 : vector<8x128xf32>
      %c0_20 = arith.constant 0 : index
      %c0_21 = arith.constant 0 : index
      %36 = vector.load %arg5[%c0_20, %c0_21] : memref<1x128xf32, #tpu.memory_space<vmem>>, vector<1x128xf32>
      %37 = vector.broadcast %36 : vector<1x128xf32> to vector<8x128xf32>
      %38 = arith.mulf %35, %37 : vector<8x128xf32>
      %c0_22 = arith.constant 0 : index
      %c0_23 = arith.constant 0 : index
      %39 = vector.load %arg6[%c0_22, %c0_23] : memref<1x128xf32, #tpu.memory_space<vmem>>, vector<1x128xf32>
      %40 = vector.broadcast %39 : vector<1x128xf32> to vector<8x128xf32>
      %41 = arith.addf %38, %40 : vector<8x128xf32>
      %c0_24 = arith.constant 0 : index
      %c0_25 = arith.constant 0 : index
      %42 = vector.load %arg7[%c0_24, %c0_25] : memref<8x128xf32, #tpu.memory_space<vmem>>, vector<8x128xf32>
      tpu.vector_store %arg7[%c0_24, %c0_25], %41 {strides = array<i32>} : memref<8x128xf32, #tpu.memory_space<vmem>>, vector<8x128xf32>,
    } else {
    }
    return
  }
  func.func @transform_0(%arg0: i32, %arg1: i32) -> (i32, i32) {
    %c0_i32 = arith.constant 0 : i32
    return %arg0, %arg1 : i32, i32
  }
  func.func @transform_1(%arg0: i32, %arg1: i32) -> (i32, i32) {
    %c0_i32 = arith.constant 0 : i32
    %c0_i32_0 = arith.constant 0 : i32
    return %arg1, %c0_i32 : i32, i32
  }
  func.func @transform_2(%arg0: i32, %arg1: i32) -> (i32, i32) {
    %c0_i32 = arith.constant 0 : i32
    %c0_i32_0 = arith.constant 0 : i32
    %c0_i32_1 = arith.constant 0 : i32
    return %c0_i32, %c0_i32_0 : i32, i32
  }
  func.func @transform_3(%arg0: i32, %arg1: i32) -> (i32, i32) {
    %c0_i32 = arith.constant 0 : i32
    %c0_i32_0 = arith.constant 0 : i32
    %c0_i32_1 = arith.constant 0 : i32
    return %c0_i32, %c0_i32_0 : i32, i32
  }
  func.func @transform_4(%arg0: i32, %arg1: i32) -> (i32, i32) {
    %c0_i32 = arith.constant 0 : i32
    %c0_i32_0 = arith.constant 0 : i32
    %c0_i32_1 = arith.constant 0 : i32
    return %c0_i32, %c0_i32_0 : i32, i32
  }
  func.func @transform_5(%arg0: i32, %arg1: i32) -> (i32, i32) {
    %c0_i32 = arith.constant 0 : i32
    %c0_i32_0 = arith.constant 0 : i32
    return %arg0, %c0_i32 : i32, i32
  }
}

</mosaic_0001>

<bundles_post_ra>
// kernel: tpu_custom_call.1
= control target key start
LH: loop header
LB: loop body
LE: loop exit
PB: predicated region body
PF: predicated region fallthrough
CT: control target
= control target key end

     0   :  { %10 = vsyncpa [#allocation4], 0  ;;  %s1108_s0 = inlined_call_operand.hbm [shape: f32[32,128], index: 0, kind: input, shape index: {}]   ;;  %s1109_s1 = inlined_call_operand.hbm [shape: f32[128,128], index: 1, kind: input, shape index: {}]   ;;  %s1110_s2 = inlined_call_operand.vmem [shape: f32[1,128], index: 2, kind: input, shape index: {}]   ;;  %s1111_s3 = inlined_call_operand.vmem [shape: f32[1,128], index: 3, kind: input, shape index: {}]   ;;  %s1112_s4 = inlined_call_operand.vmem [shape: f32[1,128], index: 4, kind: input, shape index: {}]   ;;  %s1113_s5 = inlined_call_operand.hbm [shape: f32[32,128], index: 5, kind: output, shape index: {}]  }
   0x1   :  { %12 = vsyncpa [#allocation4 + $0x1], 0 }
   0x2   :  { %13 = vsyncpa [#allocation7], 0 }
   0x3   :  { %14 = vsyncpa [#allocation5], 0 }
   0x4   :  { %16 = vsyncpa [#allocation5 + $0x1], 0  ;;  %s880_s18 = smov 0   ;;  %s882_s19 = smov 0  }
   0x5   :  { %s884_s20 = smov 0   ;;  %s886_s21 = smov 0  }
   0x6   :  { %s888_s22 = smov 0   ;;  %s890_s23 = smov 0  }
   0x7 LB: > { %s522_s24 = sadd.s32 4294967295, %s840_s23   ;;  %s523_s25 = sadd.s32 4294967294, %s840_s23   ;;  %s840_s23 = sphi %s890_s23, %s22_s23   ;;  %s836_s22 = sphi %s888_s22, %s1136_s22   ;;  %s832_s21 = sphi %s886_s21, %s1135_s21   ;;  %s828_s20 = sphi %s884_s20, %s1134_s20   ;;  %s824_s19 = sphi %s882_s19, %s1133_s19   ;;  %s820_s18 = sphi %s880_s18, %s1132_s18  }
   0x8   : > { %p56_p0 = scmp.ne.s32.totalorder %s824_s19, %s820_s18  ;;  %p914_p1 = scmp.eq.s32.totalorder %s522_s24, 0 }
   0x9   : > { %p918_p2 = scmp.eq.s32.totalorder %s522_s24, 3  ;;  %p175_p3 = scmp.eq.s32.totalorder %s523_s25, 3 }
   0xa   : > { %s1118_s26 = scalar_select %p914_p1, 1, 0 }
   0xb   : > { %s1119_s27 = scalar_select %p918_p2, 1, 0 }
   0xc   : > { %p924_p4 = por %p914_p1, %p56_p0  ;;  %p524_p5 = scmp.ge.s32.totalorder %s840_s23, 1 }
   0xd   : > { %p929_p6 = por %p175_p3, %p56_p0  ;;  %p182_p7 = scmp.lt.s32.totalorder %s840_s23, 5 }
   0xe   : > { %s1120_s28 = scalar_select %p924_p4, 1, 0 }
   0xf   : > { %s1121_s29 = scalar_select %p929_p6, 1, 0 }
  0x10   : > { %p934_p8 = pnand %p524_p5, %p182_p7  ;;  %s842_s6 = smov [#allocation6]  }
  0x11   : > { %s197_s7 = sshll.u32 %s842_s6, 4  ;;  %s34_s9 = sadd.s32 1, %s836_s22  ;;  %s198_s7 = int_to_ptr.vmem [resolvable:$true] %s197_s7 }
  0x12   : > { %s1122_s30 = scalar_select %p934_p8, 1, 0 }
  0x13   : > { %p624_p9 = pneg %p934_p8  ;;  %s696_s12 = scalar_lea.hbm %s1109_s1, 2048 }
  0x14   : > { %p697_p11 = scmp.ne.s32.totalorder %s1109_s1, %s696_s12  ;;  %p703_p3 = scmp.lt.u32.totalorder %s696_s12, %s1109_s1 }
  0x15   : > { %p942_p10 = pnand %p624_p9, %p914_p1 }
  0x17   : > { %p698_p12 = pneg %p942_p10 }
  0x19   : > { %p699_p13 = pnand %p698_p12, %p697_p11 }
  0x1b   : > { %p700_p0 = pneg %p699_p13 }
  0x1d   : > { %p705_p5 = pnand %p703_p3, %p700_p0 }
  0x1f   : > { %708 = shalt.err (!%p705_p5)
}
  0x20   : > { %s709_s17 = scalar_lea.vmem %s198_s7, 2048  ;;  %p717_p1 = scmp.lt.s32.totalorder %s198_s7, %s198_s7 }
  0x21   : > { %p710_p7 = scmp.ne.s32.totalorder %s198_s7, %s709_s17  ;;  %p718_p4 = scmp.lt.s32.totalorder %s709_s17, %s709_s17 }
  0x23   : > { %p712_p9 = pnand %p710_p7, %p698_p12  ;;  %p719_p8 = por %p718_p4, %p717_p1 }
  0x25   : > { %p713_p6 = pneg %p712_p9 }
  0x27   : > { %p720_p2 = pnand %p719_p8, %p713_p6 }
  0x29   : > { %723 = shalt.err (!%p720_p2)
}
  0x2a   : > { %s843_s24 = smov 128   ;;  %s844_s25 = smov 8  }
  0x2b   : > { %627 = dma.hbm_to_vmem [thread:$0]  (!%p942_p10), %s1109_s1, 2048, %s198_s7, [#allocation7], %s843_s24, %s843_s24, %s844_s25  }
  0x2c   : > { %p36_p1 = scmp.ge.s32.totalorder %s34_s9, 4  ;;  %s43_s11 = sadd.s32 1, %s828_s20 }
  0x2d   : > { %p50_p2 = scmp.ne.s32.totalorder %s828_s20, %s824_s19  ;;  %p51_p4 = scmp.eq.s32.totalorder %s840_s23, 0 }
  0x2e   : > { %s1138_s9 = smov (%p36_p1, %s34_s9), 0  ;;  %p1125_p8 = scmp.ne.s32.totalorder %s1119_s27, 0 }
  0x2f   : > { %p969_p6 = por %p51_p4, %p50_p2  ;;  %s38_s8 = ssub.s32 %s836_s22, %s1138_s9 }
  0x30   : > { %p975_p11 = por %p1125_p8, %p50_p2  ;;  %p637_p12 = scmp.lt.s32.totalorder %s840_s23, 4 }
  0x31   : > { %p41_p10 = scmp.eq.s32.totalorder %s38_s8, 0  ;;  %s220_s7 = sand.u32 1, %s828_s20  }
  0x32   : > { %s527_s14 = sshll.u32 %s220_s7, 3  ;;  %s528_s16 = sshll.u32 %s836_s22, 7 }
  0x33   : > { %s984_s15 = scalar_select %p41_p10, %s828_s20, %s43_s11  }
  0x34   : > { %s990_s25 = scalar_lea.hbm %s1108_s0, %s528_s16  ;;  %s224_s27 = scalar_lea.vmem [#allocation3], %s527_s14 }
  0x35   : > { %s232_s6 = sshll.u32 %s224_s27, 4  ;;  %p996_p13 = pnand %p637_p12, %p969_p6  ;;  %s992_s6 = int_to_ptr.vmem [resolvable:$true] %s232_s6 }
  0x36   : > { %s221_s11 = scalar_lea.sflag [#allocation4], %s220_s7  ;;  %s724_s8 = scalar_lea.hbm %s990_s25, 128 }
  0x37   : > { %p725_p0 = scmp.ne.s32.totalorder %s990_s25, %s724_s8  ;;  %p726_p3 = pneg %p996_p13 }
  0x38   : > { %s729_s17 = scalar_lea.hbm %s1108_s0, 512  ;;  %p730_p9 = scmp.lt.u32.totalorder %s990_s25, %s1108_s0 }
  0x39   : > { %p727_p5 = pnand %p726_p3, %p725_p0  ;;  %p731_p1 = scmp.lt.u32.totalorder %s729_s17, %s724_s8 }
  0x3a   : > { %p733_p4 = scmp.lt.u32.totalorder %s724_s8, %s990_s25 }
  0x3b   : > { %p728_p7 = pneg %p727_p5  ;;  %p732_p2 = por %p731_p1, %p730_p9 }
  0x3d   : > { %p734_p6 = por %p733_p4, %p732_p2 }
  0x3f   : > { %p735_p8 = pnand %p734_p6, %p728_p7 }
  0x41   : > { %738 = shalt.err (!%p735_p8)
}
  0x42   : > { %s739_s7 = scalar_lea.vmem %s992_s6, 128  ;;  %s845_s27 = smov [#allocation3]  }
  0x43   : > { %p740_p12 = scmp.ne.s32.totalorder %s992_s6, %s739_s7  ;;  %s744_s14 = sshll.u32 %s845_s27, 4  ;;  %s745_s14 = int_to_ptr.vmem [resolvable:$false] %s744_s14 }
  0x44   : > { %s746_s16 = scalar_lea.vmem %s745_s14, 256  ;;  %p747_p5 = scmp.lt.s32.totalorder %s992_s6, %s745_s14 }
  0x45   : > { %p742_p10 = pnand %p740_p12, %p726_p3  ;;  %p748_p9 = scmp.lt.s32.totalorder %s746_s16, %s739_s7 }
  0x47   : > { %p743_p0 = pneg %p742_p10  ;;  %p749_p1 = por %p748_p9, %p747_p5 }
  0x49   : > { %p750_p2 = pnand %p749_p1, %p743_p0 }
  0x4b   : > { %753 = shalt.err (!%p750_p2)
}
  0x4c   : > { %631 = dma.hbm_to_vmem [thread:$0]  (!%p996_p13), %s990_s25, 128, %s992_s6, %s221_s11  }
  0x4d   : > { %p1128_p7 = scmp.ne.s32.totalorder %s1122_s30, 0 }
  0x4e   : > { %s1028_s8 = sand.u32 (!%p1128_p7), 1, %s824_s19   ;;  %p1129_p3 = scmp.ne.s32.totalorder (!%p1128_p7), %s1120_s28, 0 }
  0x4f   : > { %241 = sbr.rel (%p1128_p7) target bundleno = 524 (0x20c), region = 40  ;;  %s530_s17 = sshll.u32 (!%p1128_p7), %s1028_s8, 3 }
  0x50   : > { %s244_s12 = scalar_lea.sflag (!%p1128_p7), [#allocation4], %s1028_s8  ;;  %s1034_s24 = scalar_lea.vmem (!%p1128_p7), [#allocation3], %s530_s17 }
  0x56   : > { %807 = dma.done.wait (%p1129_p3), %s244_s12, 128  }
  0x57   : > { %809 = vsyncadd (%p1129_p3), %s244_s12, 4294967168  ;;  %p1130_p13 = scmp.ne.s32.totalorder %s1118_s26, 0 }
  0x59   : > { %811 = dma.done.wait (%p1130_p13), [#allocation7], 2048  }
  0x5a   : > { %813 = vsyncadd (%p1130_p13), [#allocation7], 4294965248  ;;  %v846_v0 = vmov 0.0|0.0   ;;  %vm847_vm0 = vmmov 0   ;;  %v848_v1 = vmov 0.0   ;;  %v286_v2 = vld [vmem:[#allocation6] sm:$0xff] }
  0x5b   : > { %592 = vmatprep.subr.bf16.mxu0 %v846_v0  ;;  %589 = vmatprep.mubr.msk.f32.mxu0 %vm847_vm0, %v848_v1  ;;  %v287_v3 = vld [vmem:[#allocation6 + $0x8] sm:$0xff]  ;;  %v288_v4 = vld [vmem:[#allocation6 + $0x10] sm:$0xff]  ;;  %v289_v6 = vld [vmem:[#allocation6 + $0x18] sm:$0xff]  ;;  %s537_s11 = sshll.u32 %s832_s21, 7  ;;  %s277_s7 = scalar_lea.vmem [#allocation8], %s530_s17 }
  0x5c   : > { %v593_v5 = vpack.c.bf16 %v287_v3, %v286_v2  ;;  %v596_v7 = vpack.c.bf16 %v289_v6, %v288_v4  ;;  %v290_v8 = vld [vmem:[#allocation6 + $0x20] sm:$0xff]  ;;  %v291_v9 = vld [vmem:[#allocation6 + $0x28] sm:$0xff]  ;;  %v292_v11 = vld [vmem:[#allocation6 + $0x30] sm:$0xff]  ;;  %s431_s27 = sshll.u32 %s277_s7, 4  ;;  %s1060_s12 = scalar_lea.hbm %s1113_s5, %s537_s11  ;;  %s1062_s27 = int_to_ptr.vmem [resolvable:$true] %s431_s27 }
  0x5d   : > { %v599_v10 = vpack.c.bf16 %v291_v9, %v290_v8  ;;  %v293_v12 = vld [vmem:[#allocation6 + $0x38] sm:$0xff]  ;;  %v294_v14 = vld [vmem:[#allocation6 + $0x40] sm:$0xff]  ;;  %v295_v15 = vld [vmem:[#allocation6 + $0x48] sm:$0xff]  ;;  %s754_s26 = scalar_lea.vmem %s1062_s27, 128  ;;  %s849_s21 = smov [#allocation8]  }
  0x5e   : > { %594 = vmatpush3.bf16.msra.mxu0 %v593_v5  ;;  %v602_v13 = vpack.c.bf16 %v293_v12, %v292_v11  ;;  %v605_v16 = vpack.c.bf16 %v295_v15, %v294_v14  ;;  %v296_v17 = vld [vmem:[#allocation6 + $0x50] sm:$0xff]  ;;  %v297_v18 = vld [vmem:[#allocation6 + $0x58] sm:$0xff]  ;;  %v298_v20 = vld [vmem:[#allocation6 + $0x60] sm:$0xff]  ;;  %p755_p4 = scmp.ne.s32.totalorder %s1062_s27, %s754_s26  ;;  %s758_s17 = sshll.u32 %s849_s21, 4  ;;  %s759_s17 = int_to_ptr.vmem [resolvable:$false] %s758_s17 }
  0x5f   : > { %595 = vmatprep.subr.bf16.mxu0 %v846_v0  ;;  %v608_v19 = vpack.c.bf16 %v297_v18, %v296_v17  ;;  %v299_v21 = vld [vmem:[#allocation6 + $0x68] sm:$0xff]  ;;  %v300_v23 = vld [vmem:[#allocation6 + $0x70] sm:$0xff]  ;;  %v301_v24 = vld [vmem:[#allocation6 + $0x78] sm:$0xff]  ;;  %s760_s28 = scalar_lea.vmem %s759_s17, 256  ;;  %p761_p12 = scmp.lt.s32.totalorder %s1062_s27, %s759_s17 }
  0x60   : > { %v611_v22 = vpack.c.bf16 %v299_v21, %v298_v20  ;;  %v614_v25 = vpack.c.bf16 %v301_v24, %v300_v23  ;;  %v285_v26 = vld [vmem:[%s1034_s24] sm:$0xff]  ;;  %s418_s24 = scalar_lea.sflag [#allocation5], %s1028_s8  ;;  %p756_p6 = pnand %p755_p4, %p975_p11 }
  0x61   : > { %v533_v27 = vld [vmem:[%s1110_s2] ss:$0 sm:$0xff]  ;;  %p762_p10 = scmp.lt.s32.totalorder %s760_s28, %s754_s26 }
  0x62   : > { %597 = vmatpush3.bf16.msra.mxu0 %v596_v7  ;;  %v534_v42 = vld [vmem:[%s1111_s3] ss:$0 sm:$0xff]  ;;  %p757_p8 = pneg %p756_p6 }
  0x63   : > { %598 = vmatprep.subr.bf16.mxu0 %v846_v0  ;;  %v535_v44 = vld [vmem:[%s1112_s4] ss:$0 sm:$0xff]  ;;  %p763_p0 = por %p762_p10, %p761_p12 }
  0x65   : > { %p764_p5 = pnand %p763_p0, %p757_p8 }
  0x66   : > { %600 = vmatpush3.bf16.msra.mxu0 %v599_v10 }
  0x67   : > { %601 = vmatprep.subr.bf16.mxu0 %v846_v0 }
  0x6a   : > { %603 = vmatpush3.bf16.msra.mxu0 %v602_v13 }
  0x6b   : > { %604 = vmatprep.subr.bf16.mxu0 %v846_v0 }
  0x6e   : > { %606 = vmatpush3.bf16.msra.mxu0 %v605_v16 }
  0x6f   : > { %607 = vmatprep.subr.bf16.mxu0 %v846_v0 }
  0x72   : > { %609 = vmatpush3.bf16.msra.mxu0 %v608_v19 }
  0x73   : > { %610 = vmatprep.subr.bf16.mxu0 %v846_v0 }
  0x76   : > { %612 = vmatpush3.bf16.msra.mxu0 %v611_v22 }
  0x77   : > { %613 = vmatprep.subr.bf16.mxu0 %v846_v0 }
  0x7a   : > { %615 = vmatpush3.bf16.msra.mxu0 %v614_v25 }
  0x7d   : > { %590 = vmatmul.mubr.f32.vlgmr.msra.gmra.mrb[0].mxu0 %v285_v26 }
 0x150   : > { %v368_v28 = vpop.f32.mrb[0].mxu0 }
 0x151   : > { %v385_v29 = vadd.f32 %v533_v27, %v368_v28  ;;  %v591_v30 = vpop.f32.mrb[1].mxu0 }
 0x153   : > { %386 = vadd.xlane.f32.xlu0 %v385_v29  ;;  %v389_v31 = vmul.f32 %v385_v29, %v385_v29 }
 0x157   : > { %390 = vadd.xlane.f32.xlu0 %v389_v31 }
 0x1e0   : > { %v387_v32 = vpop.xlane.xlu0 %386 }
 0x1e1   : > { %v388_v33 = vmul.f32 0.03125, %v387_v32 }
 0x1e3   : > { %v393_v35 = vmul.f32 %v388_v33, %v388_v33  ;;  %v398_v40 = vsub.f32 %v385_v29, %v388_v33 }
 0x1e4   : > { %v391_v34 = vpop.xlane.xlu0 %390 }
 0x1e5   : > { %v392_v36 = vmul.f32 0.03125, %v391_v34 }
 0x1e7   : > { %v394_v37 = vsub.f32 %v392_v36, %v393_v35 }
 0x1e9   : > { %v395_v38 = vmax.f32 %v394_v37, 0.0 }
 0x1eb   : > { %v396_v39 = vadd.f32 1e-05, %v395_v38 }
 0x1ed   : > { %694 = vrsqrt.f32 %v396_v39 }
 0x1f7   : > { %v695_v41 = vpop.eup %694 }
 0x1f8   : > { %v399_v43 = vmul.f32 %v695_v41, %v398_v40 }
 0x1fa   : > { %v407_v45 = vmul.f32 %v534_v42, %v399_v43 }
 0x1fc   : > { %v415_v46 = vadd.f32 %v535_v44, %v407_v45 }
 0x1fe   : > { %416 = vst [vmem:[%s277_s7] sm:$0xff] %v415_v46 }
 0x1ff   : > { %767 = shalt.err (!%p764_p5)
}
 0x200   : > { %s768_s8 = scalar_lea.hbm %s1060_s12, 128  ;;  %s772_s6 = scalar_lea.hbm %s1113_s5, 512 }
 0x201   : > { %p769_p9 = scmp.ne.s32.totalorder %s1060_s12, %s768_s8  ;;  %p773_p7 = scmp.lt.u32.totalorder %s1060_s12, %s1113_s5 }
 0x202   : > { %p774_p3 = scmp.lt.u32.totalorder %s772_s6, %s768_s8  ;;  %p776_p4 = scmp.lt.u32.totalorder %s768_s8, %s1060_s12 }
 0x203   : > { %p770_p1 = pnand %p769_p9, %p975_p11 }
 0x204   : > { %p775_p13 = por %p774_p3, %p773_p7 }
 0x205   : > { %p771_p2 = pneg %p770_p1 }
 0x206   : > { %p777_p6 = por %p776_p4, %p775_p13 }
 0x208   : > { %p778_p8 = pnand %p777_p6, %p771_p2 }
 0x20a   : > { %781 = shalt.err (!%p778_p8)
}
 0x20b   : > { %622 = dma.vmem_to_hbm [thread:$0]  (%p975_p11), %s1062_s27, 128, %s1060_s12, %s418_s24  }
 0x20c PF: > { %p639_p12 = scmp.ge.s32.totalorder %s840_s23, 2  ;;  %s443_s7 = sand.u32 1, %s820_s18  }
 0x20d   : > { %p1131_p10 = scmp.ne.s32.totalorder %s1121_s29, 0  ;;  %s444_s14 = scalar_lea.sflag [#allocation5], %s443_s7 }
 0x20f   : > { %p633_p0 = pnand %p639_p12, %p1131_p10 }
 0x211   : > { %815 = dma.done.wait (!%p633_p0), %s444_s14, 128  }
 0x212   : > { %817 = vsyncadd (!%p633_p0), %s444_s14, 4294967168  ;;  %s22_s23 = sadd.s32 1, %s840_s23   ;;  %s1132_s18 = smov %s824_s19 }
 0x213   : > { %p19_p5 = scmp.ge.s32.totalorder %s22_s23, 6   ;;  %s1133_s19 = smov %s828_s20 }
 0x214   : > { %s1134_s20 = smov %s984_s15  ;;  %s1135_s21 = smov %s836_s22 }
 0x215   : > { %s1136_s22 = smov %s1138_s9  ;;  %21 = sbr.rel (!%p19_p5) target bundleno = 7 (0x7), region = 98 }
 0x21c   :  { %449 = vsyncpa [#allocation4], 1 }
 0x21d   :  { %451 = vsyncpa [#allocation4 + $0x1], 1 }
 0x21e   :  { %452 = vsyncpa [#allocation7], 1 }
 0x21f   :  { %453 = vsyncpa [#allocation5], 1 }
 0x220   :  { %455 = vsyncpa [#allocation5 + $0x1], 1 }

</bundles_post_ra>
